<compile_context>
chip_gen: v7x
topology: tpu7x:2x2x1
jax: 0.10.0
libtpu: 0.0.40
codegen_flags: <defaults>
</compile_context>

<pallas_src>
import jax
import jax.numpy as jnp
from jax import lax
from jax.experimental import pallas as pl
from jax.experimental.pallas import tpu as pltpu

LN_EPS = 1e-5


# --------------------------------------------------------------------------
# Kernel 1: fused QKV projection  (rows, d_model) @ (d_model, 3H)
# --------------------------------------------------------------------------
def _qkv_proj_kernel(h_ref, w_ref, o_ref):
    h = h_ref[...].astype(jnp.bfloat16)                     # (tm, d_model)
    o_ref[...] = jnp.dot(
        h, w_ref[...], preferred_element_type=jnp.float32
    ).astype(o_ref.dtype)                                   # (tm, 3H) bf16


# --------------------------------------------------------------------------
# Kernel 2: flash attention + output projection + residual + LayerNorm
# --------------------------------------------------------------------------
def _attn_kernel(q_ref, k_ref, v_ref, h_ref, wo_ref, g_ref, b_ref, o_ref,
                 m_sc, l_sc, acc_sc):
    ki = pl.program_id(2)

    @pl.when(ki == 0)
    def _():
        m_sc[...] = jnp.full_like(m_sc, -jnp.inf)
        l_sc[...] = jnp.zeros_like(l_sc)
        acc_sc[...] = jnp.zeros_like(acc_sc)

    q = q_ref[0]                                            # (nh, tq, dh) bf16
    k = k_ref[0]                                            # (nh, tkv, dh) bf16
    v = v_ref[0]                                            # (nh, tkv, dh) bf16

    # Scores for this KV tile, all heads in one batched dot (scale already
    # folded into the Q projection weights on the host).
    s = jnp.einsum('nqd,nkd->nqk', q, k,
                   preferred_element_type=jnp.float32)      # (nh, tq, tkv) f32

    m_prev = m_sc[...]
    m_new = jnp.maximum(m_prev, jnp.max(s, axis=-1, keepdims=True))
    alpha = jnp.exp(m_prev - m_new)
    p = jnp.exp(s - m_new)                                  # f32
    l_sc[...] = alpha * l_sc[...] + jnp.sum(p, axis=-1, keepdims=True)
    acc_sc[...] = alpha * acc_sc[...] + jnp.einsum(
        'nqk,nkd->nqd', p.astype(jnp.bfloat16), v,          # single bf16 cast
        preferred_element_type=jnp.float32)
    m_sc[...] = m_new

    @pl.when(ki == pl.num_programs(2) - 1)
    def _():
        vec = acc_sc[...] * pl.reciprocal(l_sc[...], approx=True)

        # Per-head output projection, reduced over heads (major-dim VPU add,
        # no minor-dim relayout of the head concat).
        part = lax.dot_general(vec.astype(jnp.bfloat16), wo_ref[...],
                               (((2,), (1,)), ((0,), (0,))),
                               preferred_element_type=jnp.float32)
        attn_out = jnp.sum(part, axis=0)                    # (tq, d_model)

        # Residual + post-LayerNorm with fused single-pass statistics.
        x = h_ref[0] + attn_out
        mu = jnp.mean(x, axis=-1, keepdims=True)
        ex2 = jnp.mean(x * x, axis=-1, keepdims=True)
        var = ex2 - mu * mu
        y = (x - mu) * lax.rsqrt(var + LN_EPS)
        o_ref[0] = (y * g_ref[...] + b_ref[...]).astype(o_ref.dtype)


# --------------------------------------------------------------------------
# Tiling / VMEM helpers
# --------------------------------------------------------------------------
def _largest_tile(total, target, align=8):
    """Largest divisor of `total` that is <= target and a multiple of `align`
    (falls back to `total` itself, which Pallas accepts as a full-dim block)."""
    if total <= target:
        return total
    for t in range(min(target, total), 0, -1):
        if total % t == 0 and t % align == 0:
            return t
    return total


def _vmem_limit_bytes():
    cap = 64 * 1024 * 1024                          # conservative (v7x) default
    try:
        info = pltpu.get_tpu_info()
        cap = int(getattr(info, "vmem_capacity_bytes", cap))
    except Exception:
        pass
    # ~70% of physical VMEM, capped below v6e's physical 128 MiB.
    return int(min(cap * 0.7, 100 * 1024 * 1024))


def _attn_vmem_bytes(n_head, tq, tkv, d_head, d_model):
    """Rough per-grid-step working set of kernel 2 (double-buffered blocks,
    scratch accumulators, transient score/partial tensors)."""
    bf, f32 = 2, 4
    q_blk = n_head * tq * d_head * bf * 2
    kv_blk = 2 * n_head * tkv * d_head * bf * 2
    h_blk = tq * d_model * f32 * 2
    o_blk = tq * d_model * f32 * 2
    w_blk = n_head * d_head * d_model * bf * 2
    scratch = n_head * tq * (d_head + 2) * f32
    scores = 2 * n_head * tq * tkv * f32
    partials = n_head * tq * d_model * f32
    return q_blk + kv_blk + h_blk + o_blk + w_blk + scratch + scores + partials


# --------------------------------------------------------------------------
# Forward wrapper
# --------------------------------------------------------------------------
def sentia_mha_forward(h_sbd, params, *, n_head, d_head):
    """h_sbd: (seq, batch, d_model) float32, same layout as the PyTorch module."""
    seq, bsz, d_model = h_sbd.shape
    H = n_head * d_head
    scale = 1.0 / (d_head ** 0.5)

    q_net = params["q_net"]                         # (H, d_model)
    kv_net = params["kv_net"]                       # (2H, d_model)
    o_net = params["o_net"]                         # (d_model, H)

    # Host-side weight prep: one fused (d_model, 3H) QKV weight (scale folded
    # into the Q columns), per-head output projection, bf16 once.
    w_qkv = jnp.concatenate([q_net.T * scale, kv_net.T], axis=1
                            ).astype(jnp.bfloat16)          # (d_model, 3H)
    w_o = o_net.T.reshape(n_head, d_head, d_model).astype(jnp.bfloat16)
    gamma = params["ln_gamma"].reshape(1, d_model).astype(jnp.float32)
    beta = params["ln_beta"].reshape(1, d_model).astype(jnp.float32)

    h_bsd = jnp.transpose(h_sbd, (1, 0, 2))         # (bsz, seq, d_model)
    rows = bsz * seq
    h_2d = h_bsd.reshape(rows, d_model)

    vmem_limit = _vmem_limit_bytes()

    # ---------------- kernel 1: fused QKV projection ----------------
    tm = _largest_tile(rows, 512)
    qkv = pl.pallas_call(
        _qkv_proj_kernel,
        out_shape=jax.ShapeDtypeStruct((rows, 3 * H), jnp.bfloat16),
        grid=(rows // tm,),
        in_specs=[
            pl.BlockSpec((tm, d_model), lambda i: (i, 0)),
            pl.BlockSpec((d_model, 3 * H), lambda i: (0, 0)),
        ],
        out_specs=pl.BlockSpec((tm, 3 * H), lambda i: (i, 0)),
        compiler_params=pltpu.CompilerParams(
            dimension_semantics=("parallel",),
            vmem_limit_bytes=vmem_limit),
    )(h_2d, w_qkv)

    # Wrapper-side layout plumbing (XLA, not in-kernel relayout): split the
    # fused projection into per-head Q/K/V of shape (bsz, n_head, seq, d_head).
    qkv = qkv.reshape(bsz, seq, 3, n_head, d_head)
    q = jnp.transpose(qkv[:, :, 0], (0, 2, 1, 3))
    k = jnp.transpose(qkv[:, :, 1], (0, 2, 1, 3))
    v = jnp.transpose(qkv[:, :, 2], (0, 2, 1, 3))

    # ---------------- kernel 2: flash attention + o_proj + LN ----------------
    tq = _largest_tile(seq, 256)
    tkv = _largest_tile(seq, 512)
    while _attn_vmem_bytes(n_head, tq, tkv, d_head, d_model) > vmem_limit:
        new_tkv = _largest_tile(seq, max(tkv // 2, 8))
        if new_tkv < tkv:
            tkv = new_tkv
            continue
        new_tq = _largest_tile(seq, max(tq // 2, 8))
        if new_tq < tq:
            tq = new_tq
            continue
        break

    grid = (bsz, seq // tq, seq // tkv)

    out_bsd = pl.pallas_call(
        _attn_kernel,
        out_shape=jax.ShapeDtypeStruct((bsz, seq, d_model), h_sbd.dtype),
        grid_spec=pltpu.PrefetchScalarGridSpec(
            num_scalar_prefetch=0,
            grid=grid,
            in_specs=[
                pl.BlockSpec((1, n_head, tq, d_head),
                             lambda b, qi, ki: (b, 0, qi, 0)),      # Q
                pl.BlockSpec((1, n_head, tkv, d_head),
                             lambda b, qi, ki: (b, 0, ki, 0)),      # K
                pl.BlockSpec((1, n_head, tkv, d_head),
                             lambda b, qi, ki: (b, 0, ki, 0)),      # V
                pl.BlockSpec((1, tq, d_model),
                             lambda b, qi, ki: (b, qi, 0)),         # h (residual)
                pl.BlockSpec((n_head, d_head, d_model),
                             lambda b, qi, ki: (0, 0, 0)),          # Wo
                pl.BlockSpec((1, d_model), lambda b, qi, ki: (0, 0)),  # gamma
                pl.BlockSpec((1, d_model), lambda b, qi, ki: (0, 0)),  # beta
            ],
            out_specs=pl.BlockSpec((1, tq, d_model),
                                   lambda b, qi, ki: (b, qi, 0)),
            scratch_shapes=[
                pltpu.VMEM((n_head, tq, 1), jnp.float32),   # running max
                pltpu.VMEM((n_head, tq, 1), jnp.float32),   # running sum
                pltpu.VMEM((n_head, tq, d_head), jnp.float32),  # acc
            ],
        ),
        compiler_params=pltpu.CompilerParams(
            dimension_semantics=("parallel", "parallel", "arbitrary"),
            vmem_limit_bytes=vmem_limit),
    )(q, k, v, h_bsd, w_o, gamma, beta)

    return jnp.transpose(out_bsd, (1, 0, 2))        # back to (seq, batch, d_model)


# --------------------------------------------------------------------------
# Pure-JAX f32 reference (mirrors the PyTorch forward, eval, post-norm)
# --------------------------------------------------------------------------
def reference_forward(h_sbd, params, *, n_head, d_head):
    seq, bsz, d_model = h_sbd.shape
    H = n_head * d_head
    scale = 1.0 / (d_head ** 0.5)
    q = h_sbd @ params["q_net"].T
    kv = h_sbd @ params["kv_net"].T
    k, v = kv[..., :H], kv[..., H:]
    q = q.reshape(seq, bsz, n_head, d_head)
    k = k.reshape(seq, bsz, n_head, d_head)
    v = v.reshape(seq, bsz, n_head, d_head)
    score = jnp.einsum("ibnd,jbnd->ijbn", q, k) * scale
    prob = jax.nn.softmax(score, axis=1)
    vec = jnp.einsum("ijbn,jbnd->ibnd", prob, v).reshape(seq, bsz, H)
    attn_out = vec @ params["o_net"].T
    x = h_sbd + attn_out
    mu = x.mean(-1, keepdims=True)
    var = ((x - mu) ** 2).mean(-1, keepdims=True)
    y = (x - mu) / jnp.sqrt(var + LN_EPS)
    return y * params["ln_gamma"] + params["ln_beta"]


def init_params(key, *, n_head, d_model, d_head):
    H = n_head * d_head
    k1, k2, k3 = jax.random.split(key, 3)
    return {
        "q_net": 0.05 * jax.random.normal(k1, (H, d_model), jnp.float32),
        "kv_net": 0.05 * jax.random.normal(k2, (2 * H, d_model), jnp.float32),
        "o_net": 0.05 * jax.random.normal(k3, (d_model, H), jnp.float32),
        "ln_gamma": jnp.ones((d_model,), jnp.float32),
        "ln_beta": jnp.zeros((d_model,), jnp.float32),
    }


if __name__ == "__main__":
    # NOTE: small correctness shapes; tuning decisions should be validated at
    # production sizes (d_model / seq multiples of 128) per the perf review.
    n_head, d_model, d_head = 4, 32, 8
    seq, bsz = 8, 2

    key = jax.random.PRNGKey(0)
    pkey, hkey = jax.random.split(key)
    params = init_params(pkey, n_head=n_head, d_model=d_model, d_head=d_head)
    h = jax.random.normal(hkey, (seq, bsz, d_model), jnp.float32)

    out = sentia_mha_forward(h, params, n_head=n_head, d_head=d_head)
    out = jax.block_until_ready(out)

    ref = reference_forward(h, params, n_head=n_head, d_head=d_head)
    assert out.shape == (seq, bsz, d_model)
    # bf16 MXU inputs (f32 accumulation) + approx reciprocal -> loosened tol.
    err = float(jnp.max(jnp.abs(out - ref)))
    assert jnp.allclose(out, ref, atol=2e-2, rtol=2e-2), err

    print("KERNEL_OK")
</pallas_src>

<mosaic_0001>
module attributes {stable_mosaic.version = 11 : i64} {
  func.func @_qkv_proj_kernel(%arg0: i32, %arg1: memref<16x32xf32, #tpu.memory_space<vmem>>, %arg2: memref<32x96xbf16, #tpu.memory_space<vmem>>, %arg3: memref<16x96xbf16, #tpu.memory_space<vmem>>) attributes {dimension_semantics = [#tpu.dimension_semantics<parallel>], iteration_bounds = array<i64: 1>, scalar_prefetch = 0 : i64, scratch_operands = 0 : i64, tpu.core_type = #tpu.core_type<tc>, window_params = [{transform_indices = @transform_0, window_bounds = array<i64: 16, 32>}, {pipeline_mode = #tpu.pipeline_mode<synchronous>, transform_indices = @transform_1, window_bounds = array<i64: 32, 96>}, {transform_indices = @transform_2, window_bounds = array<i64: 16, 96>}]} {
    %c0 = arith.constant 0 : index
    %c0_0 = arith.constant 0 : index
    %0 = vector.load %arg1[%c0, %c0_0] : memref<16x32xf32, #tpu.memory_space<vmem>>, vector<16x32xf32>
    %1 = arith.truncf %0 : vector<16x32xf32> to vector<16x32xbf16>
    %c0_1 = arith.constant 0 : index
    %c0_2 = arith.constant 0 : index
    %2 = vector.load %arg2[%c0_1, %c0_2] : memref<32x96xbf16, #tpu.memory_space<vmem>>, vector<32x96xbf16>
    %cst = arith.constant dense<0.000000e+00> : vector<16x96xf32>
    %3 = tpu.matmul %1, %2, %cst {dimension_numbers = #tpu.dot_dimension_numbers<[1], [0], [0], [1], [0, 0, 1, 1], [], []>} : vector<16x32xbf16>, vector<32x96xbf16>, vector<16x96xf32> -> vector<16x96xf32>
    %4 = arith.truncf %3 : vector<16x96xf32> to vector<16x96xbf16>
    %c0_3 = arith.constant 0 : index
    %c0_4 = arith.constant 0 : index
    %5 = vector.load %arg3[%c0_3, %c0_4] : memref<16x96xbf16, #tpu.memory_space<vmem>>, vector<16x96xbf16>
    tpu.vector_store %arg3[%c0_3, %c0_4], %4 {strides = array<i32>} : memref<16x96xbf16, #tpu.memory_space<vmem>>, vector<16x96xbf16>,
    return
  }
  func.func @transform_0(%arg0: i32) -> (i32, i32) {
    %c0_i32 = arith.constant 0 : i32
    %c0_i32_0 = arith.constant 0 : i32
    return %arg0, %c0_i32 : i32, i32
  }
  func.func @transform_1(%arg0: i32) -> (i32, i32) {
    %c0_i32 = arith.constant 0 : i32
    %c0_i32_0 = arith.constant 0 : i32
    %c0_i32_1 = arith.constant 0 : i32
    return %c0_i32, %c0_i32_0 : i32, i32
  }
  func.func @transform_2(%arg0: i32) -> (i32, i32) {
    %c0_i32 = arith.constant 0 : i32
    %c0_i32_0 = arith.constant 0 : i32
    return %arg0, %c0_i32 : i32, i32
  }
}

</mosaic_0001>

<bundles_post_ra>
// kernel: tpu_custom_call.1
= control target key start
LH: loop header
LB: loop body
LE: loop exit
PB: predicated region body
PF: predicated region fallthrough
CT: control target
= control target key end

     0   :  { %7 = vsyncpa [#allocation3], 0  ;;  %s301_s0 = inlined_call_operand.hbm [shape: f32[16,32], index: 0, kind: input, shape index: {}]   ;;  %s302_s1 = inlined_call_operand.hbm [shape: bf16[32,96], index: 1, kind: input, shape index: {}]   ;;  %s303_s2 = inlined_call_operand.hbm [shape: bf16[16,96], index: 2, kind: output, shape index: {}]  }
   0x1   :  { %8 = vsyncpa [#allocation6], 0 }
   0x2   :  { %9 = vsyncpa [#allocation4], 0  ;;  %s235_s9 = smov [#allocation2]   ;;  %s163_s13 = scalar_lea.hbm %s301_s0, 256 }
   0x3   :  { %s15_s10 = sshll.u32 %s235_s9, 4  ;;  %p164_p0 = scmp.ne.s32.totalorder %s301_s0, %s163_s13  ;;  %s16_s10 = int_to_ptr.vmem [resolvable:$true] %s15_s10 }
   0x4   :  { %p167_p1 = scmp.lt.u32.totalorder %s163_s13, %s301_s0 }
   0x6   :  { %p169_p2 = pnand %p167_p1, %p164_p0 }
   0x8   :  { %172 = shalt.err (!%p169_p2)
}
   0x9   :  { %s173_s18 = scalar_lea.vmem %s16_s10, 256  ;;  %p178_p4 = scmp.lt.s32.totalorder %s16_s10, %s16_s10 }
   0xa   :  { %p174_p3 = scmp.ne.s32.totalorder %s16_s10, %s173_s18  ;;  %p179_p5 = scmp.lt.s32.totalorder %s173_s18, %s173_s18 }
   0xc   :  { %p180_p6 = por %p179_p5, %p178_p4 }
   0xe   :  { %p181_p7 = pnand %p180_p6, %p174_p3 }
  0x10   :  { %184 = shalt.err (!%p181_p7)
}
  0x11   :  { %s236_s19 = smov 128   ;;  %s237_s20 = smov 8  }
  0x12   :  { %21 = dma.hbm_to_vmem [thread:$0]  %s301_s0, 256, %s16_s10, [#allocation3], %s236_s19, %s236_s19, %s237_s20  }
  0x13   :  { %s238_s23 = smov [#allocation5]   ;;  %s185_s27 = scalar_lea.hbm %s302_s1, 256 }
  0x14   :  { %s27_s24 = sshll.u32 %s238_s23, 4  ;;  %p186_p8 = scmp.ne.s32.totalorder %s302_s1, %s185_s27  ;;  %s28_s24 = int_to_ptr.vmem [resolvable:$true] %s27_s24 }
  0x15   :  { %p189_p9 = scmp.lt.u32.totalorder %s185_s27, %s302_s1 }
  0x17   :  { %p191_p10 = pnand %p189_p9, %p186_p8 }
  0x19   :  { %194 = shalt.err (!%p191_p10)
}
  0x1a   :  { %s195_s4 = scalar_lea.vmem %s28_s24, 256  ;;  %p200_p12 = scmp.lt.s32.totalorder %s28_s24, %s28_s24 }
  0x1b   :  { %p196_p11 = scmp.ne.s32.totalorder %s28_s24, %s195_s4  ;;  %p201_p13 = scmp.lt.s32.totalorder %s195_s4, %s195_s4 }
  0x1d   :  { %p202_p0 = por %p201_p13, %p200_p12 }
  0x1f   :  { %p203_p1 = pnand %p202_p0, %p196_p11 }
  0x21   :  { %206 = shalt.err (!%p203_p1)
}
  0x22   :  { %s239_s0 = smov 64   ;;  %s240_s5 = smov 4  }
  0x23   :  { %33 = dma.hbm_to_vmem [thread:$0]  %s302_s1, 256, %s28_s24, [#allocation6], %s239_s0, %s239_s0, %s240_s5  }
  0x24   :  { %229 = dma.done.wait [#allocation3], 256  }
  0x25   :  { %230 = vsyncadd [#allocation3], 4294967040 }
  0x26   :  { %231 = dma.done.wait [#allocation6], 256  }
  0x27   :  { %232 = vsyncadd [#allocation6], 4294967040  ;;  %v241_v0 = vmov 0.0   ;;  %vm242_vm0 = vmmov 0   ;;  %v161_v1 = vld [vmem:[#allocation5] sm:$0xff]   ;;  %v162_v2 = vld [vmem:[#allocation5 + $0x8] sm:$0xff]  }
  0x28   :  { %144 = vmatprep.subr.bf16.mxu0 %v241_v0  ;;  %148 = vmatprep.mubr.msk.bf16.mxu0 %vm242_vm0, %v241_v0  ;;  %v41_v3 = vld [vmem:[#allocation2] sm:$0xff]  ;;  %v42_v4 = vld [vmem:[#allocation2 + $0x8] sm:$0xff]  ;;  %vm60_vm1 = vcmask 261120   ;;  %vm113_vm2 = vcmask 781312   ;;  %s243_s1 = smov [#allocation7]  }
  0x29   :  { %145 = vmatpush3.bf16.msra.mxu0 %v161_v1  ;;  %v43_v5 = vpack.c.bf16 %v42_v4, %v41_v3  ;;  %s121_s8 = sshll.u32 %s243_s1, 4  ;;  %s122_s8 = int_to_ptr.vmem [resolvable:$true] %s121_s8 }
  0x2a   :  { %146 = vmatprep.subr.bf16.mxu0 %v241_v0  ;;  %s207_s9 = scalar_lea.vmem %s122_s8, 128  ;;  %p212_p3 = scmp.lt.s32.totalorder %s122_s8, %s122_s8 }
  0x2b   :  { %p208_p2 = scmp.ne.s32.totalorder %s122_s8, %s207_s9  ;;  %p213_p4 = scmp.lt.s32.totalorder %s207_s9, %s207_s9 }
  0x2d   :  { %147 = vmatpush3.bf16.msra.mxu0 %v162_v2  ;;  %p214_p5 = por %p213_p4, %p212_p3 }
  0x2f   :  { %p215_p6 = pnand %p214_p5, %p208_p2 }
  0x30   :  { %149 = vmatmul.mubr.msk.bf16.vlgmr.msra.gmra.mrb[0].mxu0 %vm60_vm1, %v43_v5 }
 0x103   :  { %v98_v6 = vpop.f32.mrb[0].mxu0 }
 0x104   :  { %v139_v7 = vpack.c.bf16 %v98_v6, %v98_v6  ;;  %v150_v8 = vpop.f32.mrb[1].mxu0 }
 0x105   :  { %v101_v9 = vpop.f32.mrb[2].mxu0 }
 0x106   :  { %v140_v10 = vpack.c.bf16 %v101_v9, %v101_v9  ;;  %v151_v11 = vpop.f32.mrb[3].mxu0  ;;  %114 = vst.msk [vmem:[#allocation7] sm:$0xf] %vm113_vm2, %v139_v7 }
 0x108   :  { %115 = vst.msk [vmem:[#allocation7 + $0x4] sm:$0xf] %vm113_vm2, %v140_v10 }
 0x109   :  { %218 = shalt.err (!%p215_p6)
}
 0x10a   :  { %s219_s12 = scalar_lea.hbm %s303_s2, 128 }
 0x10b   :  { %p220_p7 = scmp.ne.s32.totalorder %s303_s2, %s219_s12  ;;  %p223_p8 = scmp.lt.u32.totalorder %s219_s12, %s303_s2 }
 0x10d   :  { %p225_p9 = pnand %p223_p8, %p220_p7 }
 0x10f   :  { %228 = shalt.err (!%p225_p9)
}
 0x110   :  { %127 = dma.vmem_to_hbm [thread:$0]  %s122_s8, 128, %s303_s2, [#allocation4], %s239_s0, %s239_s0, %s240_s5  }
 0x111   :  { %233 = dma.done.wait [#allocation4], 128  }
 0x112   :  { %234 = vsyncadd [#allocation4], 4294967168 }
 0x113   :  { %131 = vsyncpa [#allocation3], 1 }
 0x114   :  { %132 = vsyncpa [#allocation6], 1 }
 0x115   :  { %133 = vsyncpa [#allocation4], 1 }

</bundles_post_ra>
